<compile_context>
chip_gen: v5e
topology: v5e:2x2
jax: 0.10.0
libtpu: 0.0.40
codegen_flags: <defaults>
</compile_context>

<pallas_src>
import functools

import jax
import jax.numpy as jnp
import numpy as np
from jax import lax
from jax.experimental import pallas as pl
from jax.experimental.pallas import tpu as pltpu

_BN_EPS = 1e-5


def _round_up(a, b):
    return (a + b - 1) // b * b


def _context_adjuster_kernel(n_hidden, *refs):
    if n_hidden > 0:
        (x_ref, w_in_ref, b_in_ref, w_hid_ref, b_hid_ref,
         w_out_ref, b_out_ref, out_ref) = refs
    else:
        (x_ref, w_in_ref, b_in_ref, w_out_ref, b_out_ref, out_ref) = refs
        w_hid_ref = b_hid_ref = None

    # Activation tile (TB, D) -> bf16 MXU operand (no-op if the producer already
    # feeds bf16), f32 accumulation throughout.
    x = x_ref[...].astype(jnp.bfloat16)

    # Linear_1 (+ folded BatchNorm_1) -> ReLU; Dropout == identity in eval mode.
    h = jnp.dot(x, w_in_ref[...], preferred_element_type=jnp.float32) + b_in_ref[...]
    h = jnp.maximum(h, 0.0)

    # Hidden Linear/BN/ReLU blocks.
    if n_hidden > 0:
        if n_hidden >= 8:
            # Deep stack: fori_loop bounds live ranges (constant vreg footprint).
            def body(l, h):
                h = jnp.dot(h.astype(jnp.bfloat16), w_hid_ref[l],
                            preferred_element_type=jnp.float32) + b_hid_ref[l]
                return jnp.maximum(h, 0.0)
            h = lax.fori_loop(0, n_hidden, body, h)
        else:
            for l in range(n_hidden):
                h = jnp.dot(h.astype(jnp.bfloat16), w_hid_ref[l],
                            preferred_element_type=jnp.float32) + b_hid_ref[l]
                h = jnp.maximum(h, 0.0)

    # output_layer + sigmoid (single tanh -> one EUP push, numerically safe).
    y = jnp.dot(h.astype(jnp.bfloat16), w_out_ref[...],
                preferred_element_type=jnp.float32) + b_out_ref[...]
    out_ref[...] = 0.5 * jnp.tanh(0.5 * y) + 0.5


def _xavier_uniform(key, fan_in, fan_out):
    bound = float(np.sqrt(6.0 / (fan_in + fan_out)))
    # Stored (in, out) so the kernel computes x @ W (== x @ W_torch.T).
    return jax.random.uniform(key, (fan_in, fan_out), jnp.float32, -bound, bound)


def init_params(key, input_dim, hidden_dim, num_layers, *, randomize_bn=True):
    """Float32 'PyTorch-equivalent' parameters: xavier-uniform weights, zero biases,
    and BatchNorm1d eval-mode statistics/affine params. `randomize_bn=True` perturbs
    the BN params so the general BN fold is actually exercised by the test."""
    n_hidden = num_layers - 1
    keys = jax.random.split(key, 3 + max(n_hidden, 1))

    def bn_params(k, shape):
        if not randomize_bn:
            return {"gamma": jnp.ones(shape, jnp.float32),
                    "beta": jnp.zeros(shape, jnp.float32),
                    "mean": jnp.zeros(shape, jnp.float32),
                    "var": jnp.ones(shape, jnp.float32)}
        k1, k2, k3, k4 = jax.random.split(k, 4)
        return {"gamma": jax.random.uniform(k1, shape, jnp.float32, 0.8, 1.2),
                "beta": 0.1 * jax.random.normal(k2, shape, jnp.float32),
                "mean": 0.1 * jax.random.normal(k3, shape, jnp.float32),
                "var": jax.random.uniform(k4, shape, jnp.float32, 0.5, 1.5)}

    p = {
        "n_hidden": n_hidden,
        "w_in": _xavier_uniform(keys[0], input_dim, hidden_dim),
        "b_in": jnp.zeros((hidden_dim,), jnp.float32),
        "bn_in": bn_params(keys[2], (hidden_dim,)),
        "w_out": _xavier_uniform(keys[1], hidden_dim, input_dim),
        "b_out": jnp.zeros((input_dim,), jnp.float32),
    }
    if n_hidden > 0:
        p["w_hid"] = jnp.stack(
            [_xavier_uniform(keys[3 + l], hidden_dim, hidden_dim) for l in range(n_hidden)])
        p["b_hid"] = jnp.zeros((n_hidden, hidden_dim), jnp.float32)
        p["bn_hid"] = bn_params(keys[3], (n_hidden, hidden_dim))
    return p


def prepare_kernel_params(p):
    """Fold eval-mode BatchNorm (running stats + affine) into the preceding Linear
    and cast weights to bf16 (biases stay f32):
        scale = gamma / sqrt(var + eps);  W' = W * scale;  b' = (b - mean)*scale + beta
    """
    kp = {}
    s_in = p["bn_in"]["gamma"] * lax.rsqrt(p["bn_in"]["var"] + _BN_EPS)        # (H,)
    kp["w_in"] = (p["w_in"] * s_in).astype(jnp.bfloat16)
    kp["b_in"] = ((p["b_in"] - p["bn_in"]["mean"]) * s_in + p["bn_in"]["beta"]
                  ).reshape(1, -1).astype(jnp.float32)
    if p["n_hidden"] > 0:
        s_h = p["bn_hid"]["gamma"] * lax.rsqrt(p["bn_hid"]["var"] + _BN_EPS)   # (L, H)
        kp["w_hid"] = (p["w_hid"] * s_h[:, None, :]).astype(jnp.bfloat16)      # (L, H, H)
        kp["b_hid"] = ((p["b_hid"] - p["bn_hid"]["mean"]) * s_h + p["bn_hid"]["beta"]
                       )[:, None, :].astype(jnp.float32)                       # (L, 1, H)
    kp["w_out"] = p["w_out"].astype(jnp.bfloat16)
    kp["b_out"] = p["b_out"].reshape(1, -1).astype(jnp.float32)
    return kp


def context_adjuster_forward(x, p, *, block_rows=512):
    B, S, D = x.shape
    H = p["w_in"].shape[1]
    n_hidden = p["n_hidden"]

    R = B * S
    # Row tile: as large as reasonable (grid-step overhead dominates at small tiles),
    # multiple of 8 sublanes. No wrapper-side padding: Pallas clips the ragged last
    # block, and rows are independent so OOB rows never contaminate real outputs.
    TB = min(block_rows, _round_up(R, 8))
    grid = (pl.cdiv(R, TB),)

    kp = prepare_kernel_params(p)
    xf = x.reshape(R, D)  # metadata-only reshape

    def const_spec(shape):
        # Constant-index block: loaded once, VMEM-resident across all grid steps,
        # single-buffered (no wasted second pipeline buffer).
        return pl.BlockSpec(shape, lambda i: (0,) * len(shape),
                            pipeline_mode=pl.Buffered(1))

    in_specs = [pl.BlockSpec((TB, D), lambda i: (i, 0)),
                const_spec((D, H)), const_spec((1, H))]
    operands = [xf, kp["w_in"], kp["b_in"]]
    if n_hidden > 0:
        L = kp["w_hid"].shape[0]
        # NOTE: for very large (L, H, H) stacks on v7x (64 MiB VMEM/TC), stream the
        # hidden weights layer-by-layer (extra 'arbitrary' grid axis / emit_pipeline)
        # instead of keeping the full stack resident.
        in_specs += [const_spec((L, H, H)), const_spec((L, 1, H))]
        operands += [kp["w_hid"], kp["b_hid"]]
    in_specs += [const_spec((H, D)), const_spec((1, D))]
    operands += [kp["w_out"], kp["b_out"]]

    # Explicit VMEM budget: single-buffered resident weights + double-buffered
    # activation in/out tiles, with 2x headroom (scoped default is only 16 MiB on
    # v5e / 32 MiB on v6e,v7x); capped at 64 MiB so it is valid on every generation.
    weight_bytes = sum(int(np.prod(a.shape)) * a.dtype.itemsize for a in operands[1:])
    act_bytes = 2 * TB * D * xf.dtype.itemsize + 2 * TB * D * 4
    vmem_limit = int(min(64 * 2**20, max(2 * (weight_bytes + act_bytes), 32 * 2**20)))

    out = pl.pallas_call(
        functools.partial(_context_adjuster_kernel, n_hidden),
        out_shape=jax.ShapeDtypeStruct((R, D), jnp.float32),
        grid=grid,
        in_specs=in_specs,
        # Direct (TB, D) output: writes only useful bytes (no padded slab, no wrapper
        # slice pass); lane-dense automatically whenever D % 128 == 0.
        out_specs=pl.BlockSpec((TB, D), lambda i: (i, 0)),
        compiler_params=pltpu.CompilerParams(
            dimension_semantics=("parallel",),
            vmem_limit_bytes=vmem_limit),
    )(*operands)

    return out.reshape(B, S, D)


def reference(x, p):
    """Pure-JAX eval-mode forward with un-folded BatchNorm, f32 weights."""
    B, S, D = x.shape
    h = x.reshape(B * S, D)

    def bn(v, st):
        return (v - st["mean"]) * lax.rsqrt(st["var"] + _BN_EPS) * st["gamma"] + st["beta"]

    h = jnp.maximum(bn(h @ p["w_in"] + p["b_in"], p["bn_in"]), 0.0)
    for l in range(p["n_hidden"]):
        st = {k: v[l] for k, v in p["bn_hid"].items()}
        h = jnp.maximum(bn(h @ p["w_hid"][l] + p["b_hid"][l], st), 0.0)
    y = h @ p["w_out"] + p["b_out"]
    return jax.nn.sigmoid(y).reshape(B, S, D)


if __name__ == "__main__":
    batch, src_len = 2, 8
    input_dim, hidden_dim, num_layers = 16, 32, 3

    key = jax.random.PRNGKey(0)
    k_x, k_p = jax.random.split(key)
    x = jax.random.normal(k_x, (batch, src_len, input_dim), jnp.float32)
    params = init_params(k_p, input_dim, hidden_dim, num_layers)

    out = context_adjuster_forward(x, params)
    jax.block_until_ready(out)

    ref = reference(x, params)
    # bf16 weights / activations (f32 accumulation) -> loose tolerance vs f32 reference.
    np.testing.assert_allclose(np.asarray(out), np.asarray(ref), rtol=2e-2, atol=2e-2)
    assert out.shape == (batch, src_len, input_dim)
    print("KERNEL_OK")
</pallas_src>

<mosaic_0001>
module attributes {stable_mosaic.version = 11 : i64} {
  func.func @_context_adjuster_kernel(%arg0: i32, %arg1: memref<16x16xf32, #tpu.memory_space<vmem>>, %arg2: memref<16x32xbf16, #tpu.memory_space<vmem>>, %arg3: memref<1x32xf32, #tpu.memory_space<vmem>>, %arg4: memref<2x32x32xbf16, #tpu.memory_space<vmem>>, %arg5: memref<2x1x32xf32, #tpu.memory_space<vmem>>, %arg6: memref<32x16xbf16, #tpu.memory_space<vmem>>, %arg7: memref<1x16xf32, #tpu.memory_space<vmem>>, %arg8: memref<16x16xf32, #tpu.memory_space<vmem>>) attributes {dimension_semantics = [#tpu.dimension_semantics<parallel>], iteration_bounds = array<i64: 1>, scalar_prefetch = 0 : i64, scratch_operands = 0 : i64, tpu.core_type = #tpu.core_type<tc>, window_params = [{transform_indices = @transform_0, window_bounds = array<i64: 16, 16>}, {pipeline_mode = #tpu.pipeline_mode<synchronous>, transform_indices = @transform_1, window_bounds = array<i64: 16, 32>}, {pipeline_mode = #tpu.pipeline_mode<synchronous>, transform_indices = @transform_2, window_bounds = array<i64: 1, 32>}, {pipeline_mode = #tpu.pipeline_mode<synchronous>, transform_indices = @transform_3, window_bounds = array<i64: 2, 32, 32>}, {pipeline_mode = #tpu.pipeline_mode<synchronous>, transform_indices = @transform_4, window_bounds = array<i64: 2, 1, 32>}, {pipeline_mode = #tpu.pipeline_mode<synchronous>, transform_indices = @transform_5, window_bounds = array<i64: 32, 16>}, {pipeline_mode = #tpu.pipeline_mode<synchronous>, transform_indices = @transform_6, window_bounds = array<i64: 1, 16>}, {transform_indices = @transform_7, window_bounds = array<i64: 16, 16>}]} {
    %c0 = arith.constant 0 : index
    %c0_0 = arith.constant 0 : index
    %0 = vector.load %arg1[%c0, %c0_0] : memref<16x16xf32, #tpu.memory_space<vmem>>, vector<16x16xf32>
    %1 = arith.truncf %0 : vector<16x16xf32> to vector<16x16xbf16>
    %c0_1 = arith.constant 0 : index
    %c0_2 = arith.constant 0 : index
    %2 = vector.load %arg2[%c0_1, %c0_2] : memref<16x32xbf16, #tpu.memory_space<vmem>>, vector<16x32xbf16>
    %cst = arith.constant dense<0.000000e+00> : vector<16x32xf32>
    %3 = tpu.matmul %1, %2, %cst {dimension_numbers = #tpu.dot_dimension_numbers<[1], [0], [0], [1], [0, 0, 1, 1], [], []>} : vector<16x16xbf16>, vector<16x32xbf16>, vector<16x32xf32> -> vector<16x32xf32>
    %c0_3 = arith.constant 0 : index
    %c0_4 = arith.constant 0 : index
    %4 = vector.load %arg3[%c0_3, %c0_4] : memref<1x32xf32, #tpu.memory_space<vmem>>, vector<1x32xf32>
    %5 = vector.broadcast %4 : vector<1x32xf32> to vector<16x32xf32>
    %6 = arith.addf %3, %5 : vector<16x32xf32>
    %cst_5 = arith.constant 0.000000e+00 : f32
    %7 = vector.broadcast %cst_5 : f32 to vector<16x32xf32>
    %8 = arith.maximumf %6, %7 : vector<16x32xf32>
    %9 = arith.truncf %8 : vector<16x32xf32> to vector<16x32xbf16>
    %c0_6 = arith.constant 0 : index
    %c0_7 = arith.constant 0 : index
    %c0_8 = arith.constant 0 : index
    %10 = vector.load %arg4[%c0_6, %c0_7, %c0_8] : memref<2x32x32xbf16, #tpu.memory_space<vmem>>, vector<1x32x32xbf16>
    %11 = vector.shape_cast %10 : vector<1x32x32xbf16> to vector<32x32xbf16>
    %cst_9 = arith.constant dense<0.000000e+00> : vector<16x32xf32>
    %12 = tpu.matmul %9, %11, %cst_9 {dimension_numbers = #tpu.dot_dimension_numbers<[1], [0], [0], [1], [0, 0, 1, 1], [], []>} : vector<16x32xbf16>, vector<32x32xbf16>, vector<16x32xf32> -> vector<16x32xf32>
    %c0_10 = arith.constant 0 : index
    %c0_11 = arith.constant 0 : index
    %c0_12 = arith.constant 0 : index
    %13 = vector.load %arg5[%c0_10, %c0_11, %c0_12] : memref<2x1x32xf32, #tpu.memory_space<vmem>>, vector<1x1x32xf32>
    %14 = vector.shape_cast %13 : vector<1x1x32xf32> to vector<1x32xf32>
    %15 = vector.broadcast %14 : vector<1x32xf32> to vector<16x32xf32>
    %16 = arith.addf %12, %15 : vector<16x32xf32>
    %cst_13 = arith.constant 0.000000e+00 : f32
    %17 = vector.broadcast %cst_13 : f32 to vector<16x32xf32>
    %18 = arith.maximumf %16, %17 : vector<16x32xf32>
    %19 = arith.truncf %18 : vector<16x32xf32> to vector<16x32xbf16>
    %c1 = arith.constant 1 : index
    %c0_14 = arith.constant 0 : index
    %c0_15 = arith.constant 0 : index
    %20 = vector.load %arg4[%c1, %c0_14, %c0_15] : memref<2x32x32xbf16, #tpu.memory_space<vmem>>, vector<1x32x32xbf16>
    %21 = vector.shape_cast %20 : vector<1x32x32xbf16> to vector<32x32xbf16>
    %cst_16 = arith.constant dense<0.000000e+00> : vector<16x32xf32>
    %22 = tpu.matmul %19, %21, %cst_16 {dimension_numbers = #tpu.dot_dimension_numbers<[1], [0], [0], [1], [0, 0, 1, 1], [], []>} : vector<16x32xbf16>, vector<32x32xbf16>, vector<16x32xf32> -> vector<16x32xf32>
    %c1_17 = arith.constant 1 : index
    %c0_18 = arith.constant 0 : index
    %c0_19 = arith.constant 0 : index
    %23 = vector.load %arg5[%c1_17, %c0_18, %c0_19] : memref<2x1x32xf32, #tpu.memory_space<vmem>>, vector<1x1x32xf32>
    %24 = vector.shape_cast %23 : vector<1x1x32xf32> to vector<1x32xf32>
    %25 = vector.broadcast %24 : vector<1x32xf32> to vector<16x32xf32>
    %26 = arith.addf %22, %25 : vector<16x32xf32>
    %cst_20 = arith.constant 0.000000e+00 : f32
    %27 = vector.broadcast %cst_20 : f32 to vector<16x32xf32>
    %28 = arith.maximumf %26, %27 : vector<16x32xf32>
    %29 = arith.truncf %28 : vector<16x32xf32> to vector<16x32xbf16>
    %c0_21 = arith.constant 0 : index
    %c0_22 = arith.constant 0 : index
    %30 = vector.load %arg6[%c0_21, %c0_22] : memref<32x16xbf16, #tpu.memory_space<vmem>>, vector<32x16xbf16>
    %cst_23 = arith.constant dense<0.000000e+00> : vector<16x16xf32>
    %31 = tpu.matmul %29, %30, %cst_23 {dimension_numbers = #tpu.dot_dimension_numbers<[1], [0], [0], [1], [0, 0, 1, 1], [], []>} : vector<16x32xbf16>, vector<32x16xbf16>, vector<16x16xf32> -> vector<16x16xf32>
    %c0_24 = arith.constant 0 : index
    %c0_25 = arith.constant 0 : index
    %32 = vector.load %arg7[%c0_24, %c0_25] : memref<1x16xf32, #tpu.memory_space<vmem>>, vector<1x16xf32>
    %33 = vector.broadcast %32 : vector<1x16xf32> to vector<16x16xf32>
    %34 = arith.addf %31, %33 : vector<16x16xf32>
    %cst_26 = arith.constant 5.000000e-01 : f32
    %35 = vector.broadcast %cst_26 : f32 to vector<16x16xf32>
    %36 = arith.mulf %35, %34 : vector<16x16xf32>
    %37 = math.tanh %36 : vector<16x16xf32>
    %cst_27 = arith.constant 5.000000e-01 : f32
    %38 = vector.broadcast %cst_27 : f32 to vector<16x16xf32>
    %39 = arith.mulf %38, %37 : vector<16x16xf32>
    %cst_28 = arith.constant 5.000000e-01 : f32
    %40 = vector.broadcast %cst_28 : f32 to vector<16x16xf32>
    %41 = arith.addf %39, %40 : vector<16x16xf32>
    %c0_29 = arith.constant 0 : index
    %c0_30 = arith.constant 0 : index
    %42 = vector.load %arg8[%c0_29, %c0_30] : memref<16x16xf32, #tpu.memory_space<vmem>>, vector<16x16xf32>
    tpu.vector_store %arg8[%c0_29, %c0_30], %41 {strides = array<i32>} : memref<16x16xf32, #tpu.memory_space<vmem>>, vector<16x16xf32>,
    return
  }
  func.func @transform_0(%arg0: i32) -> (i32, i32) {
    %c0_i32 = arith.constant 0 : i32
    %c0_i32_0 = arith.constant 0 : i32
    return %arg0, %c0_i32 : i32, i32
  }
  func.func @transform_1(%arg0: i32) -> (i32, i32) {
    %c0_i32 = arith.constant 0 : i32
    %c0_i32_0 = arith.constant 0 : i32
    %c0_i32_1 = arith.constant 0 : i32
    return %c0_i32, %c0_i32_0 : i32, i32
  }
  func.func @transform_2(%arg0: i32) -> (i32, i32) {
    %c0_i32 = arith.constant 0 : i32
    %c0_i32_0 = arith.constant 0 : i32
    %c0_i32_1 = arith.constant 0 : i32
    return %c0_i32, %c0_i32_0 : i32, i32
  }
  func.func @transform_3(%arg0: i32) -> (i32, i32, i32) {
    %c0_i32 = arith.constant 0 : i32
    %c0_i32_0 = arith.constant 0 : i32
    %c0_i32_1 = arith.constant 0 : i32
    %c0_i32_2 = arith.constant 0 : i32
    return %c0_i32, %c0_i32_0, %c0_i32_1 : i32, i32, i32
  }
  func.func @transform_4(%arg0: i32) -> (i32, i32, i32) {
    %c0_i32 = arith.constant 0 : i32
    %c0_i32_0 = arith.constant 0 : i32
    %c0_i32_1 = arith.constant 0 : i32
    %c0_i32_2 = arith.constant 0 : i32
    return %c0_i32, %c0_i32_0, %c0_i32_1 : i32, i32, i32
  }
  func.func @transform_5(%arg0: i32) -> (i32, i32) {
    %c0_i32 = arith.constant 0 : i32
    %c0_i32_0 = arith.constant 0 : i32
    %c0_i32_1 = arith.constant 0 : i32
    return %c0_i32, %c0_i32_0 : i32, i32
  }
  func.func @transform_6(%arg0: i32) -> (i32, i32) {
    %c0_i32 = arith.constant 0 : i32
    %c0_i32_0 = arith.constant 0 : i32
    %c0_i32_1 = arith.constant 0 : i32
    return %c0_i32, %c0_i32_0 : i32, i32
  }
  func.func @transform_7(%arg0: i32) -> (i32, i32) {
    %c0_i32 = arith.constant 0 : i32
    %c0_i32_0 = arith.constant 0 : i32
    return %arg0, %c0_i32 : i32, i32
  }
}

</mosaic_0001>

<bundles_post_ra>
// kernel: tpu_custom_call.1
= control target key start
LH: loop header
LB: loop body
LE: loop exit
PB: predicated region body
PF: predicated region fallthrough
CT: control target
= control target key end

     0   :  { %12 = vsyncpa [#allocation3], 0  ;;  %s463_s0 = inlined_call_operand.vmem [shape: f32[16,16], index: 0, kind: input, shape index: {}]   ;;  %s464_s1 = inlined_call_operand.vmem [shape: bf16[16,32], index: 1, kind: input, shape index: {}]   ;;  %s465_s2 = inlined_call_operand.hbm [shape: f32[1,32], index: 2, kind: input, shape index: {}]   ;;  %s466_s3 = inlined_call_operand.hbm [shape: bf16[2,32,32], index: 3, kind: input, shape index: {}]   ;;  %s467_s4 = inlined_call_operand.vmem [shape: f32[2,1,32], index: 4, kind: input, shape index: {}]   ;;  %s468_s5 = inlined_call_operand.vmem [shape: bf16[32,16], index: 5, kind: input, shape index: {}]   ;;  %s469_s6 = inlined_call_operand.vmem [shape: f32[1,16], index: 6, kind: input, shape index: {}]   ;;  %s470_s7 = inlined_call_operand.hbm [shape: f32[16,16], index: 7, kind: output, shape index: {}]  }
   0x1   :  { %13 = vsyncpa [#allocation6], 0 }
   0x2   :  { %14 = vsyncpa [#allocation4], 0  ;;  %s24_s26 = sshll.u32 %s465_s2, 4  ;;  %s377_s27 = smov [#allocation2]   ;;  %s25_s26 = int_to_ptr.hbm [resolvable:$true] %s24_s26 }
   0x3   :  { %s26_s28 = sshll.u32 %s377_s27, 4  ;;  %s34_s8 = sshll.u32 %s466_s3, 4  ;;  %s27_s28 = int_to_ptr.vmem [resolvable:$true] %s26_s28  ;;  %s35_s8 = int_to_ptr.hbm [resolvable:$true] %s34_s8 }
   0x4   :  { %29 = dma.hbm_to_vmem [thread:$0]  %s25_s26, 16, %s27_s28, [#allocation3]  }
   0x5   :  { %s378_s9 = smov [#allocation5]   ;;  %s379_s11 = smov 64  }
   0x6   :  { %s36_s10 = sshll.u32 %s378_s9, 4  ;;  %s380_s12 = smov 4   ;;  %s37_s10 = int_to_ptr.vmem [resolvable:$true] %s36_s10 }
   0x7   :  { %42 = dma.hbm_to_vmem [thread:$0]  %s35_s8, 512, %s37_s10, [#allocation6], %s379_s11, %s379_s11, %s380_s12  }
   0x8   :  { %371 = dma.done.wait [#allocation3], 16  }
   0x9   :  { %372 = vsyncadd [#allocation3], 4294967280 }
   0xa   :  { %373 = dma.done.wait [#allocation6], 512  }
   0xb   :  { %374 = vsyncadd [#allocation6], 4294966784  ;;  %v277_v0 = vld [vmem:[%s464_s1] sm:$0xff]  ;;  %v59_v2 = vld [vmem:[%s463_s0 + $0x8] sm:$0xff]  ;;  %vm73_vm0 = vcmask 130048   ;;  %vm114_vm1 = vcmask 261120  }
   0xc   :  { %v58_v1 = vld [vmem:[%s463_s0] sm:$0xff]  ;;  %84 = vmatpush.bf16.msra.mxu0 %v277_v0  ;;  %v279_v4 = vld [vmem:[#allocation5 + $0x8] sm:$0xff]  ;;  %v280_v15 = vld [vmem:[#allocation5 + $0x10] sm:$0xff]  ;;  %s230_s27 = sshll.u32 %s470_s7, 4  ;;  %s383_s28 = smov 8   ;;  %s231_s27 = int_to_ptr.hbm [resolvable:$true] %s230_s27 }
   0xd   :  { %v60_v3 = vpack.c.bf16 %v59_v2, %v58_v1  ;;  %124 = vmatpush.bf16.msra.mxu1 %v279_v4  ;;  %v278_v5 = vld [vmem:[#allocation5] sm:$0xff]  ;;  %v291_v7 = vld [vmem:[#allocation2] ss:$0 sm:$0xff]  ;;  %v293_v27 = vld [vmem:[%s467_s4 + $0x1] ss:$0 sm:$0xff] }
   0xe   :  { %v281_v14 = vld [vmem:[#allocation5 + $0x18] sm:$0xff]  ;;  %v283_v24 = vld [vmem:[%s468_s5 + $0x8] sm:$0xff] }
   0xf   :  { %248 = vmatmul.msk.bf16.vlgmr.msra.gmra.mxu0 %vm73_vm0, %v60_v3  ;;  %166 = vmatpush.bf16.msra.mxu2 %v281_v14  ;;  %v292_v17 = vld [vmem:[%s467_s4] ss:$0 sm:$0xff]  ;;  %s381_s4 = smov [#allocation7]  }
  0x10   :  { %206 = vmatpush.bf16.msra.mxu3 %v283_v24  ;;  %v282_v25 = vld [vmem:[%s468_s5] sm:$0xff]  ;;  %s228_s5 = sshll.u32 %s381_s4, 4  ;;  %s229_s5 = int_to_ptr.vmem [resolvable:$true] %s228_s5 }
  0x11   :  { %125 = vmatpush.bf16.msra.mxu1 %v278_v5  ;;  %v294_v34 = vld [vmem:[%s469_s6] ss:$0 sm:$0xff]  ;;  %s382_s6 = smov 128  }
  0x13   :  { %167 = vmatpush.bf16.msra.mxu2 %v280_v15 }
  0x14   :  { %207 = vmatpush.bf16.msra.mxu3 %v282_v25 }
  0x8c   :  { %v86_v6 = vpop.f32.mrf.mxu0 }
  0x8d   :  { %v87_v8 = vadd.f32 %v291_v7, %v86_v6 }
  0x8f   :  { %v91_v11 = vmax.f32 %v87_v8, 0.0 }
  0x94   :  { %v88_v9 = vpop.f32.mrf.mxu0 }
  0x95   :  { %v89_v10 = vadd.f32 %v291_v7, %v88_v9 }
  0x97   :  { %v92_v12 = vmax.f32 %v89_v10, 0.0 }
  0x99   :  { %v93_v13 = vpack.c.bf16 %v92_v12, %v91_v11 }
  0x9b   :  { %257 = vmatmul.msk.bf16.vlgmr.msra.gmra.mxu1 %vm114_vm1, %v93_v13 }
 0x118   :  { %v127_v16 = vpop.f32.mrf.mxu1 }
 0x119   :  { %v128_v18 = vadd.f32 %v292_v17, %v127_v16 }
 0x11b   :  { %v132_v21 = vmax.f32 %v128_v18, 0.0 }
 0x120   :  { %v129_v19 = vpop.f32.mrf.mxu1 }
 0x121   :  { %v130_v20 = vadd.f32 %v292_v17, %v129_v19 }
 0x123   :  { %v133_v22 = vmax.f32 %v130_v20, 0.0 }
 0x125   :  { %v134_v23 = vpack.c.bf16 %v133_v22, %v132_v21 }
 0x127   :  { %267 = vmatmul.msk.bf16.vlgmr.msra.gmra.mxu2 %vm114_vm1, %v134_v23 }
 0x1aa   :  { %v169_v26 = vpop.f32.mrf.mxu2 }
 0x1ab   :  { %v170_v28 = vadd.f32 %v293_v27, %v169_v26 }
 0x1ad   :  { %v174_v31 = vmax.f32 %v170_v28, 0.0 }
 0x1b2   :  { %v171_v29 = vpop.f32.mrf.mxu2 }
 0x1b3   :  { %v172_v30 = vadd.f32 %v293_v27, %v171_v29 }
 0x1b5   :  { %v175_v32 = vmax.f32 %v172_v30, 0.0 }
 0x1b7   :  { %v176_v33 = vpack.c.bf16 %v175_v32, %v174_v31 }
 0x1b9   :  { %276 = vmatmul.msk.bf16.vlgmr.msra.gmra.mxu3 %vm114_vm1, %v176_v33 }
 0x23c   :  { %v209_v35 = vpop.f32.mrf.mxu3 }
 0x23d   :  { %v210_v36 = vadd.f32 %v294_v34, %v209_v35 }
 0x23f   :  { %v214_v37 = vmul.f32 0.5, %v210_v36 }
 0x241   :  { %295 = vtanh.f32 %v214_v37 }
 0x244   :  { %v211_v38 = vpop.f32.mrf.mxu3 }
 0x245   :  { %v212_v39 = vadd.f32 %v294_v34, %v211_v38 }
 0x247   :  { %v296_v40 = vpop.eup %295  ;;  %v215_v41 = vmul.f32 0.5, %v212_v39 }
 0x248   :  { %v218_v42 = vmul.f32 0.5, %v296_v40 }
 0x249   :  { %297 = vtanh.f32 %v215_v41 }
 0x24a   :  { %v220_v43 = vadd.f32 0.5, %v218_v42 }
 0x24c   :  { %222 = vst.msk [vmem:[#allocation7] sm:$0xff] %vm73_vm0, %v220_v43 }
 0x24f   :  { %v298_v44 = vpop.eup %297 }
 0x250   :  { %v219_v45 = vmul.f32 0.5, %v298_v44 }
 0x252   :  { %v221_v46 = vadd.f32 0.5, %v219_v45 }
 0x254   :  { %223 = vst.msk [vmem:[#allocation7 + $0x8] sm:$0xff] %vm73_vm0, %v221_v46 }
 0x255   :  { %236 = dma.vmem_to_hbm [thread:$0]  %s229_s5, 256, %s231_s27, [#allocation4], %s382_s6, %s382_s6, %s383_s28  }
 0x256   :  { %375 = dma.done.wait [#allocation4], 256  }
 0x257   :  { %376 = vsyncadd [#allocation4], 4294967040 }
 0x258   :  { %241 = vsyncpa [#allocation3], 1 }
 0x259   :  { %242 = vsyncpa [#allocation6], 1 }
 0x25a   :  { %243 = vsyncpa [#allocation4], 1 }

</bundles_post_ra>
